<compile_context>
chip_gen: v5e
topology: v5e:2x2
jax: 0.10.0
libtpu: 0.0.40
codegen_flags: <defaults>
</compile_context>

<pallas_src>
import jax
import jax.numpy as jnp
from jax.experimental import pallas as pl
from jax.experimental.pallas import tpu as pltpu


HIDDEN = 32        # complex hidden width of the MLP
TILE_N = 2048      # samples (lanes) per grid step; wrapper pads N to a multiple


def _complex_pinn_kernel(xt_ref, p0_ref, p1_ref, p2_ref, out_ref):
    x = xt_ref[0:1, :]                    # (1, TILE_N)
    t = xt_ref[1:2, :]                    # (1, TILE_N)

    # ---- layer 0: folded-normalization broadcast FMAs on the VPU, tanh ----
    # p0 columns: [w_x | w_t | b], rows: [real(0:H); imag(H:2H)]
    z = jnp.tanh(p0_ref[:, 0:1] * x + p0_ref[:, 1:2] * t + p0_ref[:, 2:3])
    # z: (2*hidden, TILE_N) = [zr; zi]

    # ---- layer 1: ONE block-packed complex matmul on the MXU, tanh ----
    k = p1_ref.shape[0]                   # 2 * hidden
    z = jnp.tanh(
        jnp.dot(p1_ref[:, :k], z, preferred_element_type=jnp.float32)
        + p1_ref[:, k:k + 1])

    # ---- layer 2: block-packed complex output (row 0 = Re, row 1 = Im) ----
    out_ref[...] = (
        jnp.dot(p2_ref[:, :k], z, preferred_element_type=jnp.float32)
        + p2_ref[:, k:k + 1])


def make_params(key, hidden=HIDDEN):
    """Deterministic complex-MLP parameters: [2 -> hidden -> hidden -> 1]."""
    dims = [(2, hidden), (hidden, hidden), (hidden, 1)]
    params = []
    for (din, dout) in dims:
        key, kr, ki = jax.random.split(key, 3)
        scale = 1.0 / jnp.sqrt(jnp.float32(din))
        wr = scale * jax.random.normal(kr, (din, dout), dtype=jnp.float32)
        wi = scale * jax.random.normal(ki, (din, dout), dtype=jnp.float32)
        br = jnp.zeros((1, dout), dtype=jnp.float32)
        bi = jnp.zeros((1, dout), dtype=jnp.float32)
        params.extend([wr, wi, br, bi])
    return params


def _pack_params(lb, ub, params):
    """Fold input normalization into layer 0 and block-pack the complex linears
    for the transposed (features-on-sublanes, samples-on-lanes) layout."""
    (w0r, w0i, b0r, b0i,
     w1r, w1i, b1r, b1i,
     w2r, w2i, b2r, b2i) = params

    # H_norm = H * s + c  with  s = 2/(ub-lb),  c = -2*lb/(ub-lb) - 1
    s = 2.0 / (ub - lb)                    # (1, 2)
    c = -2.0 * lb / (ub - lb) - 1.0        # (1, 2)
    w0r_f = w0r * s.reshape(2, 1)          # diag(s) @ w0
    w0i_f = w0i * s.reshape(2, 1)
    b0r_f = b0r + c @ w0r                  # (1, H)
    b0i_f = b0i + c @ w0i

    # layer-0 packed: columns [w_x | w_t | b], rows [real; imag]  -> (2H, 3)
    wx = jnp.concatenate([w0r_f[0], w0i_f[0]])
    wt = jnp.concatenate([w0r_f[1], w0i_f[1]])
    b0 = jnp.concatenate([b0r_f[0], b0i_f[0]])
    p0 = jnp.stack([wx, wt, b0], axis=1)

    # complex linear, transposed layout:
    # [out_r; out_i] = [[Wr^T, -Wi^T],[Wi^T, Wr^T]] @ [in_r; in_i] + [br; bi]
    def pack_linear(wr, wi, br, bi):
        wp = jnp.block([[wr.T, -wi.T], [wi.T, wr.T]])    # (2*dout, 2*din)
        bp = jnp.concatenate([br[0], bi[0]])[:, None]    # (2*dout, 1)
        return jnp.concatenate([wp, bp], axis=1)         # (2*dout, 2*din + 1)

    p1 = pack_linear(w1r, w1i, b1r, b1i)                 # (2H, 2H + 1)
    p2 = pack_linear(w2r, w2i, b2r, b2i)                 # (2,  2H + 1)
    return p0, p1, p2


def complex_pinn_forward(x, t, lb, ub, params, tile_n=TILE_N):
    """x, t: (N, 1) float32.  Returns complex64 (N, 1) = model(scale(cat(x,t)))."""
    N = x.shape[0]
    p0, p1, p2 = _pack_params(lb, ub, params)
    two_h = p1.shape[0]

    # For small N, shrink the tile so the grid still has >= 2 "parallel" steps
    # (keeps both TensorCores busy on v7x); keep it lane-aligned (mult of 128).
    half = pl.cdiv(N, 2)
    tile_n = int(min(tile_n, max(128, pl.cdiv(half, 128) * 128)))
    n_pad = int(pl.cdiv(N, tile_n)) * tile_n

    # Samples on the lane axis: (2, n_pad), row 0 = x, row 1 = t.
    xt = jnp.concatenate([x.reshape(1, N), t.reshape(1, N)], axis=0)
    if n_pad != N:
        xt = jnp.pad(xt, ((0, 0), (0, n_pad - N)))

    grid = (n_pad // tile_n,)
    io_spec = pl.BlockSpec((2, tile_n), lambda i: (0, i))
    const = lambda arr: pl.BlockSpec(arr.shape, lambda i: (0, 0))

    cost = pl.CostEstimate(
        flops=n_pad * (4 * two_h + 2 * two_h * two_h + 4 * two_h),
        transcendentals=n_pad * 2 * two_h,
        bytes_accessed=4 * (xt.size + 2 * n_pad + p0.size + p1.size + p2.size),
    )

    out = pl.pallas_call(
        _complex_pinn_kernel,
        out_shape=jax.ShapeDtypeStruct((2, n_pad), jnp.float32),
        grid_spec=pltpu.PrefetchScalarGridSpec(
            num_scalar_prefetch=0,
            grid=grid,
            in_specs=[io_spec, const(p0), const(p1), const(p2)],
            out_specs=io_spec,
        ),
        compiler_params=pltpu.CompilerParams(
            dimension_semantics=("parallel",)),
        cost_estimate=cost,
    )(xt, p0, p1, p2)

    return (out[0, :N] + 1j * out[1, :N]).astype(jnp.complex64).reshape(N, 1)


def _reference_forward(x, t, lb, ub, params):
    """Plain-JAX reference of the original (unfolded, unpacked) forward pass."""
    H = jnp.concatenate([x, t], axis=1)
    H = 2.0 * (H - lb) / (ub - lb) - 1.0
    (w0r, w0i, b0r, b0i,
     w1r, w1i, b1r, b1i,
     w2r, w2i, b2r, b2i) = params
    zr = jnp.tanh(H @ w0r + b0r)
    zi = jnp.tanh(H @ w0i + b0i)
    ar = zr @ w1r - zi @ w1i + b1r
    ai = zr @ w1i + zi @ w1r + b1i
    zr, zi = jnp.tanh(ar), jnp.tanh(ai)
    outr = zr @ w2r - zi @ w2i + b2r
    outi = zr @ w2i + zi @ w2r + b2i
    return outr + 1j * outi.astype(jnp.complex64)


if __name__ == "__main__":
    key = jax.random.PRNGKey(0)
    k_x, k_t, k_p = jax.random.split(key, 3)

    N = 256
    # x in [-7, 7], t in [0, 1] like the harmonic-oscillator data.
    x = jax.random.uniform(k_x, (N, 1), dtype=jnp.float32, minval=-7.0, maxval=7.0)
    t = jax.random.uniform(k_t, (N, 1), dtype=jnp.float32, minval=0.0, maxval=1.0)
    lb = jnp.array([[-7.0, 0.0]], dtype=jnp.float32)
    ub = jnp.array([[7.0, 1.0]], dtype=jnp.float32)

    params = make_params(k_p)

    out = complex_pinn_forward(x, t, lb, ub, params)
    out = jax.block_until_ready(out)

    ref = _reference_forward(x, t, lb, ub, params)
    assert out.shape == (N, 1) and out.dtype == jnp.complex64
    assert jnp.allclose(out, ref, atol=1e-5, rtol=1e-5)

    print("KERNEL_OK")
</pallas_src>

<mosaic_0001>
module attributes {stable_mosaic.version = 11 : i64} {
  func.func @_complex_pinn_kernel(%arg0: i32, %arg1: memref<2x128xf32, #tpu.memory_space<vmem>>, %arg2: memref<64x3xf32, #tpu.memory_space<vmem>>, %arg3: memref<64x65xf32, #tpu.memory_space<vmem>>, %arg4: memref<2x65xf32, #tpu.memory_space<vmem>>, %arg5: memref<2x128xf32, #tpu.memory_space<vmem>>) attributes {dimension_semantics = [#tpu.dimension_semantics<parallel>], iteration_bounds = array<i64: 2>, scalar_prefetch = 0 : i64, scratch_operands = 0 : i64, tpu.core_type = #tpu.core_type<tc>, window_params = [{transform_indices = @transform_0, window_bounds = array<i64: 2, 128>}, {pipeline_mode = #tpu.pipeline_mode<synchronous>, transform_indices = @transform_1, window_bounds = array<i64: 64, 3>}, {pipeline_mode = #tpu.pipeline_mode<synchronous>, transform_indices = @transform_2, window_bounds = array<i64: 64, 65>}, {pipeline_mode = #tpu.pipeline_mode<synchronous>, transform_indices = @transform_3, window_bounds = array<i64: 2, 65>}, {transform_indices = @transform_4, window_bounds = array<i64: 2, 128>}]} {
    %c0 = arith.constant 0 : index
    %c0_0 = arith.constant 0 : index
    %0 = vector.load %arg1[%c0, %c0_0] : memref<2x128xf32, #tpu.memory_space<vmem>>, vector<1x128xf32>
    %c1 = arith.constant 1 : index
    %c0_1 = arith.constant 0 : index
    %1 = vector.load %arg1[%c1, %c0_1] : memref<2x128xf32, #tpu.memory_space<vmem>>, vector<1x128xf32>
    %c0_2 = arith.constant 0 : index
    %c0_3 = arith.constant 0 : index
    %2 = vector.load %arg2[%c0_2, %c0_3] : memref<64x3xf32, #tpu.memory_space<vmem>>, vector<64x1xf32>
    %3 = vector.broadcast %2 : vector<64x1xf32> to vector<64x128xf32>
    %4 = vector.broadcast %0 : vector<1x128xf32> to vector<64x128xf32>
    %5 = arith.mulf %3, %4 : vector<64x128xf32>
    %c0_4 = arith.constant 0 : index
    %c1_5 = arith.constant 1 : index
    %6 = vector.load %arg2[%c0_4, %c1_5] : memref<64x3xf32, #tpu.memory_space<vmem>>, vector<64x1xf32>
    %7 = vector.broadcast %6 : vector<64x1xf32> to vector<64x128xf32>
    %8 = vector.broadcast %1 : vector<1x128xf32> to vector<64x128xf32>
    %9 = arith.mulf %7, %8 : vector<64x128xf32>
    %10 = arith.addf %5, %9 : vector<64x128xf32>
    %c0_6 = arith.constant 0 : index
    %c2 = arith.constant 2 : index
    %11 = vector.load %arg2[%c0_6, %c2] : memref<64x3xf32, #tpu.memory_space<vmem>>, vector<64x1xf32>
    %12 = vector.broadcast %11 : vector<64x1xf32> to vector<64x128xf32>
    %13 = arith.addf %10, %12 : vector<64x128xf32>
    %14 = math.tanh %13 : vector<64x128xf32>
    %c0_7 = arith.constant 0 : index
    %c0_8 = arith.constant 0 : index
    %15 = vector.load %arg3[%c0_7, %c0_8] : memref<64x65xf32, #tpu.memory_space<vmem>>, vector<64x64xf32>
    %cst = arith.constant dense<0.000000e+00> : vector<64x128xf32>
    %16 = tpu.matmul %15, %14, %cst {dimension_numbers = #tpu.dot_dimension_numbers<[1], [0], [0], [1], [0, 0, 1, 1], [], []>} : vector<64x64xf32>, vector<64x128xf32>, vector<64x128xf32> -> vector<64x128xf32>
    %c0_9 = arith.constant 0 : index
    %c64 = arith.constant 64 : index
    %17 = vector.load %arg3[%c0_9, %c64] : memref<64x65xf32, #tpu.memory_space<vmem>>, vector<64x1xf32>
    %18 = vector.broadcast %17 : vector<64x1xf32> to vector<64x128xf32>
    %19 = arith.addf %16, %18 : vector<64x128xf32>
    %20 = math.tanh %19 : vector<64x128xf32>
    %c0_10 = arith.constant 0 : index
    %c0_11 = arith.constant 0 : index
    %21 = vector.load %arg4[%c0_10, %c0_11] : memref<2x65xf32, #tpu.memory_space<vmem>>, vector<2x64xf32>
    %cst_12 = arith.constant dense<0.000000e+00> : vector<2x128xf32>
    %22 = tpu.matmul %21, %20, %cst_12 {dimension_numbers = #tpu.dot_dimension_numbers<[1], [0], [0], [1], [0, 0, 1, 1], [], []>} : vector<2x64xf32>, vector<64x128xf32>, vector<2x128xf32> -> vector<2x128xf32>
    %c0_13 = arith.constant 0 : index
    %c64_14 = arith.constant 64 : index
    %23 = vector.load %arg4[%c0_13, %c64_14] : memref<2x65xf32, #tpu.memory_space<vmem>>, vector<2x1xf32>
    %24 = vector.broadcast %23 : vector<2x1xf32> to vector<2x128xf32>
    %25 = arith.addf %22, %24 : vector<2x128xf32>
    %c0_15 = arith.constant 0 : index
    %c0_16 = arith.constant 0 : index
    %26 = vector.load %arg5[%c0_15, %c0_16] : memref<2x128xf32, #tpu.memory_space<vmem>>, vector<2x128xf32>
    tpu.vector_store %arg5[%c0_15, %c0_16], %25 {strides = array<i32>} : memref<2x128xf32, #tpu.memory_space<vmem>>, vector<2x128xf32>,
    return
  }
  func.func @transform_0(%arg0: i32) -> (i32, i32) {
    %c0_i32 = arith.constant 0 : i32
    %c0_i32_0 = arith.constant 0 : i32
    return %c0_i32, %arg0 : i32, i32
  }
  func.func @transform_1(%arg0: i32) -> (i32, i32) {
    %c0_i32 = arith.constant 0 : i32
    %c0_i32_0 = arith.constant 0 : i32
    %c0_i32_1 = arith.constant 0 : i32
    return %c0_i32, %c0_i32_0 : i32, i32
  }
  func.func @transform_2(%arg0: i32) -> (i32, i32) {
    %c0_i32 = arith.constant 0 : i32
    %c0_i32_0 = arith.constant 0 : i32
    %c0_i32_1 = arith.constant 0 : i32
    return %c0_i32, %c0_i32_0 : i32, i32
  }
  func.func @transform_3(%arg0: i32) -> (i32, i32) {
    %c0_i32 = arith.constant 0 : i32
    %c0_i32_0 = arith.constant 0 : i32
    %c0_i32_1 = arith.constant 0 : i32
    return %c0_i32, %c0_i32_0 : i32, i32
  }
  func.func @transform_4(%arg0: i32) -> (i32, i32) {
    %c0_i32 = arith.constant 0 : i32
    %c0_i32_0 = arith.constant 0 : i32
    return %c0_i32, %arg0 : i32, i32
  }
}

</mosaic_0001>

<bundles_post_ra>
// kernel: tpu_custom_call.1
= control target key start
LH: loop header
LB: loop body
LE: loop exit
PB: predicated region body
PF: predicated region fallthrough
CT: control target
= control target key end

     0   :  { %9 = vsyncpa [#allocation3], 0  ;;  %s962_s0 = inlined_call_operand.vmem [shape: f32[2,256], index: 0, kind: input, shape index: {}]   ;;  %s963_s1 = inlined_call_operand.vmem [shape: f32[64,3], index: 1, kind: input, shape index: {}]   ;;  %s964_s2 = inlined_call_operand.vmem [shape: f32[64,65], index: 2, kind: input, shape index: {}]   ;;  %s965_s3 = inlined_call_operand.vmem [shape: f32[2,65], index: 3, kind: input, shape index: {}]   ;;  %s966_s4 = inlined_call_operand.hbm [shape: f32[2,256], index: 4, kind: output, shape index: {}]  }
   0x1   :  { %11 = vsyncpa [#allocation3 + $0x1], 0  ;;  %s785_s15 = smov 0   ;;  %s787_s16 = smov 0  }
   0x2   :  { %s789_s17 = smov 0   ;;  %s791_s18 = smov 0  }
   0x3 LB: > { %s806_s19 = sadd.s32 4294967295, %s754_s18   ;;  %s567_s20 = sadd.s32 4294967294, %s754_s18   ;;  %s754_s18 = sphi %s791_s18, %s972_s18   ;;  %s750_s17 = sphi %s789_s17, %s971_s17   ;;  %s746_s16 = sphi %s787_s16, %s970_s16   ;;  %s742_s15 = sphi %s785_s15, %s969_s15  }
   0x4   : > { %s810_s21 = sadd.s32 1, %s754_s18   ;;  %s113_s22 = sadd.s32 1, %s750_s17 }
   0x5   : > { %s110_s23 = ssub.s32 %s754_s18, %s810_s21  ;;  %p123_p0 = scmp.ne.s32.totalorder %s750_s17, %s746_s16 }
   0x6   : > { %p111_p1 = scmp.eq.s32.totalorder %s110_s23, 0  ;;  %p124_p2 = scmp.eq.s32.totalorder %s806_s19, 1 }
   0x7   : > { %p129_p3 = scmp.ne.s32.totalorder %s746_s16, %s742_s15  ;;  %p130_p4 = scmp.eq.s32.totalorder %s567_s20, 1 }
   0x8   : > { %s821_s24 = scalar_select %p111_p1, %s750_s17, %s113_s22  }
   0x9   : > { %p823_p5 = por %p124_p2, %p123_p0  ;;  %p827_p6 = por %p130_p4, %p129_p3 }
   0xa   : > { %p570_p7 = scmp.ge.s32.totalorder %s754_s18, 1  ;;  %p164_p8 = scmp.lt.s32.totalorder %s754_s18, 3 }
   0xc   : > { %p165_p9 = pnand %p570_p7, %p164_p8 }
   0xd   : > { %p189_p10 = scmp.lt.s32.totalorder (!%p165_p9), %s806_s19, 1  ;;  %s186_s6 = sand.u32 (!%p165_p9), 1, %s746_s16  }
   0xe   : > { %168 = sbr.rel (%p165_p9) target bundleno = 513 (0x201), region = 36  ;;  %s493_s20 = scalar_lea.sflag (!%p165_p9), [#allocation3], %s186_s6 }
   0xf   : > { %s712_s28 = scalar_lea.hbm (!%p165_p9), %s966_s4, 4 }
  0x13   : > { %v202_v0 = vld [vmem:[%s963_s1 + $0x38] sm:$0xff]  ;;  %v201_v1 = vld [vmem:[%s963_s1 + $0x30] sm:$0xff]  ;;  %v200_v2 = vld [vmem:[%s963_s1 + $0x28] sm:$0xff]  ;;  %v756_v3 = vmov 0   ;;  %s190_s7 = scalar_select %p189_p10, %s806_s19, 1  ;;  %v757_v4 = vmov 1  }
  0x14   : > { %649 = vset.pattern.permute.xlu2 %v756_v3  ;;  %647 = vset.pattern.permute.xlu1 %v756_v3  ;;  %v199_v5 = vld [vmem:[%s963_s1 + $0x20] sm:$0xff]  ;;  %v758_v6 = vmov 2   ;;  %v198_v7 = vld [vmem:[%s963_s1 + $0x18] sm:$0xff]  ;;  %v197_v8 = vld [vmem:[%s963_s1 + $0x10] sm:$0xff]  ;;  %v759_v46 = vmov 64   ;;  %vm397_vm0 = vcmask 523264  }
  0x15   : > { %645 = vset.pattern.permute.xlu0 %v756_v3  ;;  %235 = vperm.xlu1 %647, %v201_v1   ;;  %s572_s8 = sshll.u32 %s190_s7, 1  ;;  %v196_v9 = vld [vmem:[%s963_s1 + $0x8] sm:$0xff]  ;;  %v195_v10 = vld [vmem:[%s963_s1] sm:$0xff]  ;;  %v881_v45 = vld [vmem:[%s964_s2 + $0x38] sm:$0xff]  ;;  %s571_s7 = sshll.u32 %s186_s6, 1 }
  0x16   : > { %240 = vperm.xlu0 %645, %v202_v0   ;;  %230 = vperm.xlu2 %649, %v200_v2   ;;  %s847_s11 = scalar_lea.vmem %s962_s0, %s572_s8  ;;  %v887_v50 = vld [vmem:[%s964_s2 + $0x18] sm:$0xff]  ;;  %v354_v56 = vld [vmem:[%s964_s2 + $0x28] sm:$0xff]  ;;  %v355_v59 = vld [vmem:[%s964_s2 + $0x30] sm:$0xff]  ;;  %s583_s8 = sshll.u32 %s806_s19, 1 }
  0x17   : > { %v865_v18 = vld [vmem:[%s847_s11 + $0x1] ss:$0 sm:$0xff]  ;;  %v868_v19 = vld [vmem:[%s847_s11] ss:$0 sm:$0xff]  ;;  %s503_s11 = scalar_lea.hbm %s966_s4, %s583_s8  ;;  %s188_s12 = scalar_lea.vmem [#allocation2], %s571_s7 }
  0x18   : > { %s505_s13 = sshll.u32 %s188_s12, 4  ;;  %s507_s14 = sshll.u32 %s503_s11, 4  ;;  %s506_s13 = int_to_ptr.vmem [resolvable:$true] %s505_s13  ;;  %s508_s14 = int_to_ptr.hbm [resolvable:$true] %s507_s14 }
  0x19   : > { %s706_s22 = sshra.s32 %s508_s14, 4  ;;  %s707_s22 = int_to_ptr.hbm [resolvable:$true] %s706_s22 }
  0x1a   : > { %s708_s23 = scalar_lea.hbm %s707_s22, 2  ;;  %p713_p0 = scmp.lt.s32.totalorder %s707_s22, %s966_s4 }
  0x1b   : > { %p709_p11 = scmp.ne.s32.totalorder %s707_s22, %s708_s23  ;;  %p714_p1 = scmp.lt.s32.totalorder %s712_s28, %s708_s23 }
  0x1d   : > { %648 = vset.pattern.permute.xlu1 %v757_v4  ;;  %p710_p12 = pnand %p709_p11, %p823_p5  ;;  %p715_p2 = por %p714_p1, %p713_p0 }
  0x1e   : > { %646 = vset.pattern.permute.xlu0 %v757_v4  ;;  %650 = vset.pattern.permute.xlu2 %v757_v4 }
  0x1f   : > { %281 = vperm.xlu0 %646, %v202_v0   ;;  %277 = vperm.xlu1 %648, %v201_v1   ;;  %p711_p13 = pneg %p710_p12 }
  0x20   : > { %273 = vperm.xlu2 %650, %v200_v2  }
  0x21   : > { %p716_p3 = pnand %p715_p2, %p711_p13 }
  0x27   : > { %651 = vset.pattern.permute.xlu1 %v758_v6  ;;  %269 = vperm.xlu0 %646, %v199_v5  }
  0x28   : > { %652 = vset.pattern.permute.xlu2 %v756_v3  ;;  %330 = vperm.xlu1 %651, %v202_v0  }
  0x29   : > { %225 = vperm.xlu2 %652, %v199_v5  }
  0x2f   : > { %265 = vperm.xlu0 %646, %v198_v7  }
  0x30   : > { %326 = vperm.xlu1 %651, %v201_v1  }
  0x31   : > { %220 = vperm.xlu2 %652, %v198_v7  }
  0x37   : > { %261 = vperm.xlu0 %646, %v197_v8  }
  0x38   : > { %322 = vperm.xlu1 %651, %v200_v2  }
  0x39   : > { %215 = vperm.xlu2 %652, %v197_v8  }
  0x3f   : > { %257 = vperm.xlu0 %646, %v196_v9  }
  0x40   : > { %318 = vperm.xlu1 %651, %v199_v5  }
  0x41   : > { %210 = vperm.xlu2 %652, %v196_v9  }
  0x47   : > { %253 = vperm.xlu0 %646, %v195_v10  }
  0x48   : > { %314 = vperm.xlu1 %651, %v198_v7  }
  0x49   : > { %205 = vperm.xlu2 %652, %v195_v10  }
  0x4f   : > { %654 = vset.pattern.permute.xlu0 %v758_v6 }
  0x50   : > { %310 = vperm.xlu1 %651, %v197_v8   ;;  %302 = vperm.xlu0 %654, %v195_v10  }
  0x51   : > { %653 = vset.pattern.permute.xlu2 %v758_v6  ;;  %v351_v6 = vld [vmem:[%s964_s2 + $0x10] sm:$0xff] }
  0x52   : > { %306 = vperm.xlu2 %653, %v196_v9   ;;  %v353_v9 = vld [vmem:[%s964_s2 + $0x20] sm:$0xff] }
  0x58   : > { %655 = vset.pattern.permute.xlu1 %v759_v46  ;;  %657 = vset.pattern.permute.xlu0 %v759_v46 }
  0x59   : > { %394 = vperm.xlu1 %655, %v881_v45   ;;  %374 = vperm.xlu0 %657, %v887_v50  }
  0x5a   : > { %656 = vset.pattern.permute.xlu2 %v759_v46 }
  0x5b   : > { %389 = vperm.xlu2 %656, %v355_v59  }
  0x61   : > { %384 = vperm.xlu1 %655, %v354_v56  }
  0x63   : > { %379 = vperm.xlu2 %656, %v353_v9  }
  0x69   : > { %369 = vperm.xlu1 %655, %v351_v6  }
  0x70   : > { %v231_v11 = vpop.permute.xlu2 %230 }
  0x71   : > { %v249_v35 = vmul.f32 %v868_v19, %v231_v11 }
  0x7a   : > { %v274_v12 = vpop.permute.xlu2 %273 }
  0x7b   : > { %v290_v36 = vmul.f32 %v865_v18, %v274_v12 }
  0x7d   : > { %v298_v38 = vadd.f32 %v290_v36, %v249_v35 }
  0x83   : > { %v226_v15 = vpop.permute.xlu2 %225 }
  0x84   : > { %v248_v42 = vmul.f32 %v868_v19, %v226_v15 }
  0x87   : > { %v236_v13 = vpop.permute.xlu1 %235 }
  0x88   : > { %v241_v14 = vpop.permute.xlu0 %240  ;;  %v250_v28 = vmul.f32 %v868_v19, %v236_v13 }
  0x89   : > { %v251_v21 = vmul.f32 %v868_v19, %v241_v14 }
  0x8b   : > { %v221_v24 = vpop.permute.xlu2 %220 }
  0x8c   : > { %v247_v54 = vmul.f32 %v868_v19, %v221_v24 }
  0x91   : > { %v282_v16 = vpop.permute.xlu0 %281  ;;  %v278_v17 = vpop.permute.xlu1 %277 }
  0x92   : > { %v292_v20 = vmul.f32 %v865_v18, %v282_v16  ;;  %v291_v27 = vmul.f32 %v865_v18, %v278_v17  ;;  %v349_v17 = vld [vmem:[%s964_s2] sm:$0xff] }
  0x93   : > { %v216_v34 = vpop.permute.xlu2 %215  ;;  %359 = vperm.xlu1 %655, %v349_v17  }
  0x94   : > { %v300_v23 = vadd.f32 %v292_v20, %v251_v21  ;;  %v299_v30 = vadd.f32 %v291_v27, %v250_v28  ;;  %v246_v2 = vmul.f32 %v868_v19, %v216_v34 }
  0x99   : > { %v270_v22 = vpop.permute.xlu0 %269 }
  0x9a   : > { %v331_v25 = vpop.permute.xlu1 %330  ;;  %v289_v43 = vmul.f32 %v865_v18, %v270_v22  ;;  %v463_v22 = vld [vmem:[%s965_s3] sm:$0x3] }
  0x9b   : > { %v340_v26 = vadd.f32 %v331_v25, %v300_v23  ;;  %v211_v44 = vpop.permute.xlu2 %210 }
  0x9c   : > { %v297_v48 = vadd.f32 %v289_v43, %v248_v42  ;;  %v245_v0 = vmul.f32 %v868_v19, %v211_v44 }
  0x9d   : > { %660 = vtanh.f32 %v340_v26 }
  0xa1   : > { %v266_v29 = vpop.permute.xlu0 %265 }
  0xa2   : > { %v327_v31 = vpop.permute.xlu1 %326  ;;  %v288_v53 = vmul.f32 %v865_v18, %v266_v29 }
  0xa3   : > { %v661_v32 = vpop.eup %660  ;;  %v339_v33 = vadd.f32 %v327_v31, %v299_v30  ;;  %v206_v55 = vpop.permute.xlu2 %205 }
  0xa4   : > { %422 = vmatpush.msra.mxu0 %v661_v32  ;;  %586 = vmatpush.msra.mxu2 %v661_v32  ;;  %v296_v58 = vadd.f32 %v288_v53, %v247_v54  ;;  %v244_v7 = vmul.f32 %v868_v19, %v206_v55 }
  0xa5   : > { %662 = vtanh.f32 %v339_v33  ;;  %587 = vmatpush.msra.mxu3 %v661_v32 }
  0xa9   : > { %v262_v37 = vpop.permute.xlu0 %261 }
  0xaa   : > { %v323_v39 = vpop.permute.xlu1 %322  ;;  %v287_v1 = vmul.f32 %v865_v18, %v262_v37 }
  0xab   : > { %v663_v40 = vpop.eup %662  ;;  %v338_v41 = vadd.f32 %v323_v39, %v298_v38 }
  0xac   : > { %423 = vmatpush.msra.mxu0 %v663_v40  ;;  %588 = vmatpush.msra.mxu2 %v663_v40  ;;  %v307_v5 = vpop.permute.xlu2 %306  ;;  %v295_v8 = vadd.f32 %v287_v1, %v246_v2 }
  0xad   : > { %664 = vtanh.f32 %v338_v41  ;;  %589 = vmatpush.msra.mxu3 %v663_v40 }
  0xb1   : > { %v258_v47 = vpop.permute.xlu0 %257 }
  0xb2   : > { %v319_v49 = vpop.permute.xlu1 %318  ;;  %v286_v62 = vmul.f32 %v865_v18, %v258_v47 }
  0xb3   : > { %v665_v51 = vpop.eup %664  ;;  %v337_v52 = vadd.f32 %v319_v49, %v297_v48 }
  0xb4   : > { %424 = vmatpush.msra.mxu0 %v665_v51  ;;  %590 = vmatpush.msra.mxu2 %v665_v51  ;;  %v294_v3 = vadd.f32 %v286_v62, %v245_v0 }
  0xb5   : > { %666 = vtanh.f32 %v337_v52  ;;  %591 = vmatpush.msra.mxu3 %v665_v51  ;;  %v390_v26 = vpop.permute.xlu2 %389 }
  0xb6   : > { %v334_v13 = vadd.f32 %v307_v5, %v294_v3 }
  0xb9   : > { %v254_v57 = vpop.permute.xlu0 %253 }
  0xba   : > { %v315_v60 = vpop.permute.xlu1 %314  ;;  %v285_v4 = vmul.f32 %v865_v18, %v254_v57  ;;  %v350_v18 = vld [vmem:[%s964_s2 + $0x8] sm:$0xff] }
  0xbb   : > { %v667_v61 = vpop.eup %666  ;;  %v336_v63 = vadd.f32 %v315_v60, %v296_v58  ;;  %364 = vperm.xlu2 %656, %v350_v18  }
  0xbc   : > { %425 = vmatpush.msra.mxu0 %v667_v61  ;;  %592 = vmatpush.msra.mxu2 %v667_v61  ;;  %v293_v15 = vadd.f32 %v285_v4, %v244_v7 }
  0xbd   : > { %668 = vtanh.f32 %v336_v63  ;;  %593 = vmatpush.msra.mxu3 %v667_v61  ;;  %v380_v31 = vpop.permute.xlu2 %379 }
  0xc2   : > { %v311_v10 = vpop.permute.xlu1 %310  ;;  %v303_v11 = vpop.permute.xlu0 %302 }
  0xc3   : > { %v669_v12 = vpop.eup %668  ;;  %v335_v14 = vadd.f32 %v311_v10, %v295_v8  ;;  %v333_v16 = vadd.f32 %v303_v11, %v293_v15  ;;  %466 = vperm.xlu2 %656, %v463_v22  }
  0xc4   : > { %426 = vmatpush.msra.mxu0 %v669_v12  ;;  %594 = vmatpush.msra.mxu2 %v669_v12 }
  0xc5   : > { %670 = vtanh.f32 %v335_v14  ;;  %595 = vmatpush.msra.mxu3 %v669_v12 }
  0xc6   : > { %672 = vtanh.f32 %v334_v13 }
  0xc7   : > { %674 = vtanh.f32 %v333_v16 }
  0xcb   : > { %v671_v19 = vpop.eup %670  ;;  %v395_v23 = vpop.permute.xlu1 %394 }
  0xcc   : > { %427 = vmatpush.msra.mxu0 %v671_v19  ;;  %596 = vmatpush.msra.mxu2 %v671_v19  ;;  %v673_v20 = vpop.eup %672  ;;  %v375_v38 = vpop.permute.xlu0 %374 }
  0xcd   : > { %597 = vmatpush.msra.mxu3 %v671_v19  ;;  %v675_v21 = vpop.eup %674 }
  0xce   : > { %428 = vmatpush.msra.mxu0 %v673_v20  ;;  %598 = vmatpush.msra.mxu2 %v673_v20 }
  0xcf   : > { %599 = vmatpush.msra.mxu3 %v673_v20 }
  0xd0   : > { %429 = vmatpush.msra.mxu0 %v675_v21  ;;  %600 = vmatpush.msra.mxu2 %v675_v21 }
  0xd1   : > { %601 = vmatpush.msra.mxu3 %v675_v21  ;;  %575 = vmatmul.msk.f32.vlgmr.msra.gmra.mxu2 %vm397_vm0, %v351_v6 }
  0xd2   : > { %578 = vmatmul.msk.f32.vlgmr.msra.gmra.mxu3 %vm397_vm0, %v354_v56  ;;  %573 = vmatmul.msk.f32.vlgmr.msra.gmra.mxu0 %vm397_vm0, %v349_v17 }
  0xd3   : > { %v385_v27 = vpop.permute.xlu1 %384 }
  0xd9   : > { %576 = vmatmul.msk.f32.gmra.mxu2 %vm397_vm0, %v887_v50 }
  0xda   : > { %579 = vmatmul.msk.f32.gmra.mxu3 %vm397_vm0, %v355_v59  ;;  %574 = vmatmul.msk.f32.gmra.mxu0 %vm397_vm0, %v350_v18 }
  0xdb   : > { %v370_v32 = vpop.permute.xlu1 %369 }
  0xe1   : > { %577 = vmatmul.msk.f32.gmra.mxu2 %vm397_vm0, %v353_v9 }
  0xe2   : > { %580 = vmatmul.msk.f32.gmra.mxu3 %vm397_vm0, %v881_v45 }
 0x105   : > { %v360_v45 = vpop.permute.xlu1 %359 }
 0x115   : > { %v365_v44 = vpop.permute.xlu2 %364 }
 0x11d   : > { %v467_v55 = vpop.permute.xlu2 %466 }
 0x14f   : > { %v431_v30 = vpop.f32.mrf.mxu0 }
 0x150   : > { %v432_v49 = vadd.f32 %v431_v30, %v360_v45 }
 0x154   : > { %v437_v24 = vpop.f32.mrf.mxu2 }
 0x155   : > { %v446_v25 = vpop.f32.mrf.mxu3  ;;  %v438_v43 = vadd.f32 %v437_v24, %v370_v32 }
 0x156   : > { %v447_v37 = vadd.f32 %v446_v25, %v385_v27 }
 0x157   : > { %v434_v41 = vpop.f32.mrf.mxu0 }
 0x158   : > { %v435_v47 = vadd.f32 %v434_v41, %v365_v44 }
 0x15c   : > { %v440_v28 = vpop.f32.mrf.mxu2 }
 0x15d   : > { %v449_v29 = vpop.f32.mrf.mxu3  ;;  %v441_v40 = vadd.f32 %v440_v28, %v375_v38 }
 0x15e   : > { %v450_v34 = vadd.f32 %v449_v29, %v390_v26 }
 0x164   : > { %v443_v36 = vpop.f32.mrf.mxu2 }
 0x165   : > { %v452_v33 = vpop.f32.mrf.mxu3  ;;  %v444_v39 = vadd.f32 %v443_v36, %v380_v31 }
 0x166   : > { %v453_v35 = vadd.f32 %v452_v33, %v395_v23 }
 0x168   : > { %676 = vtanh.f32 %v453_v35 }
 0x169   : > { %678 = vtanh.f32 %v450_v34 }
 0x16a   : > { %680 = vtanh.f32 %v447_v37 }
 0x16b   : > { %682 = vtanh.f32 %v444_v39 }
 0x16c   : > { %684 = vtanh.f32 %v441_v40 }
 0x16d   : > { %686 = vtanh.f32 %v438_v43 }
 0x16e   : > { %v677_v42 = vpop.eup %676  ;;  %688 = vtanh.f32 %v435_v47 }
 0x16f   : > { %479 = vmatpush.msra.mxu1 %v677_v42  ;;  %v679_v46 = vpop.eup %678  ;;  %690 = vtanh.f32 %v432_v49 }
 0x170   : > { %v681_v48 = vpop.eup %680 }
 0x171   : > { %480 = vmatpush.msra.mxu1 %v679_v46  ;;  %v683_v50 = vpop.eup %682 }
 0x172   : > { %v685_v51 = vpop.eup %684 }
 0x173   : > { %481 = vmatpush.msra.mxu1 %v681_v48  ;;  %v687_v52 = vpop.eup %686 }
 0x174   : > { %v689_v53 = vpop.eup %688 }
 0x175   : > { %482 = vmatpush.msra.mxu1 %v683_v50  ;;  %v691_v54 = vpop.eup %690 }
 0x177   : > { %483 = vmatpush.msra.mxu1 %v685_v51 }
 0x179   : > { %484 = vmatpush.msra.mxu1 %v687_v52 }
 0x17b   : > { %485 = vmatpush.msra.mxu1 %v689_v53 }
 0x17d   : > { %486 = vmatpush.msra.mxu1 %v691_v54 }
 0x17e   : > { %581 = vmatmul.msk.f32.vlgmr.msra.gmra.mxu1 %vm397_vm0, %v463_v22 }
 0x1fb   : > { %v488_v56 = vpop.f32.mrf.mxu1 }
 0x1fc   : > { %v489_v57 = vadd.f32 %v488_v56, %v467_v55 }
 0x1fe   : > { %491 = vst [vmem:[%s188_s12] sm:$0x3] %v489_v57 }
 0x1ff   : > { %719 = shalt.err (!%p716_p3)
}
 0x200   : > { %602 = dma.vmem_to_hbm [thread:$0]  (%p823_p5), %s506_s13, 32, %s508_s14, %s493_s20  }
 0x201 PF: > { %p608_p4 = scmp.ge.s32.totalorder %s754_s18, 2  ;;  %s519_s5 = sand.u32 1, %s742_s15  }
 0x202   : > { %s520_s6 = scalar_lea.sflag [#allocation3], %s519_s5 }
 0x203   : > { %p605_p7 = pnand %p608_p4, %p827_p6 }
 0x205   : > { %p606_p8 = pneg %p605_p7 }
 0x207   : > { %737 = dma.done.wait (%p606_p8), %s520_s6, 32  }
 0x208   : > { %739 = vsyncadd (%p606_p8), %s520_s6, 4294967264  ;;  %p14_p9 = scmp.ge.s32.totalorder %s810_s21, 4   ;;  %s969_s15 = smov %s746_s16 }
 0x209   : > { %s970_s16 = smov %s750_s17  ;;  %s971_s17 = smov %s821_s24 }
 0x20a   : > { %s972_s18 = smov %s810_s21  ;;  %16 = sbr.rel (!%p14_p9) target bundleno = 3 (0x3), region = 71 }
 0x20f   :  { %526 = vsyncpa [#allocation3], 1 }
 0x210   :  { %528 = vsyncpa [#allocation3 + $0x1], 1 }

</bundles_post_ra>
